<compile_context>
chip_gen: v7x
topology: tpu7x:2x2x1
jax: 0.10.0
libtpu: 0.0.40
codegen_flags: <defaults>
</compile_context>

<pallas_src>
import functools

import jax
import jax.numpy as jnp
from jax.experimental import pallas as pl
from jax.experimental.pallas import tpu as pltpu


NUM_CLASSES_PADDED = 128        # pad class dim to a full lane width -> dense unmasked vst
SUBLANE = 8                     # f32 sublane multiple
PALLAS_MIN_ELEMENTS = 64 * 1024 # below this the fused-XLA path wins (launch overhead)


def _round_up(x, m):
    return (x + m - 1) // m * m


def classifier_kernel(t_ref, v_ref, wt_ref, wv_ref, b_ref, o_ref):
    # logits = [text, image] @ W + b, computed as two MXU pushes so the wrapper never
    # materializes the concatenated features in HBM.  dropout(p=0.0) == identity.
    acc = jnp.dot(t_ref[...], wt_ref[...], preferred_element_type=jnp.float32)
    acc = acc + jnp.dot(v_ref[...], wv_ref[...], preferred_element_type=jnp.float32)
    o_ref[...] = (acc + b_ref[...]).astype(o_ref.dtype)


def prepare_classifier_params(w_classifier, b_classifier, hid_dim_t, hid_dim_v):
    """One-time parameter prep (model-load time, not per forward).

    w_classifier: [D, num_classes] (already transposed vs. torch's [out, in]).
    b_classifier: [num_classes].
    Returns (wt_pad [Kt_pad, 128], wv_pad [Kv_pad, 128], b_pad [1, 128]) with the
    contraction dims padded to sublane multiples and classes zero-padded to 128.
    """
    D, num_classes = w_classifier.shape
    assert D == hid_dim_t + hid_dim_v
    kt_pad = _round_up(hid_dim_t, SUBLANE)
    kv_pad = _round_up(hid_dim_v, SUBLANE)
    wt = jnp.zeros((kt_pad, NUM_CLASSES_PADDED), dtype=w_classifier.dtype)
    wt = wt.at[:hid_dim_t, :num_classes].set(w_classifier[:hid_dim_t])
    wv = jnp.zeros((kv_pad, NUM_CLASSES_PADDED), dtype=w_classifier.dtype)
    wv = wv.at[:hid_dim_v, :num_classes].set(w_classifier[hid_dim_t:])
    bp = jnp.zeros((1, NUM_CLASSES_PADDED), dtype=b_classifier.dtype)
    bp = bp.at[0, :num_classes].set(b_classifier)
    return wt, wv, bp


def _pad2(x, rows, cols):
    if x.shape == (rows, cols):
        return x
    return jnp.pad(x, ((0, rows - x.shape[0]), (0, cols - x.shape[1])))


@functools.partial(jax.jit, static_argnums=(5,))
def _forward_pallas(text_emb, image_emb, wt_pad, wv_pad, b_pad, num_classes):
    B = text_emb.shape[0]
    B_pad = _round_up(B, SUBLANE)
    kt_pad, kv_pad = wt_pad.shape[0], wv_pad.shape[0]
    t = _pad2(text_emb, B_pad, kt_pad)   # no-op when already aligned
    v = _pad2(image_emb, B_pad, kv_pad)

    itemsize = 4
    cost = pl.CostEstimate(
        flops=2 * B_pad * (kt_pad + kv_pad) * NUM_CLASSES_PADDED,
        transcendentals=0,
        bytes_accessed=itemsize * (
            B_pad * (kt_pad + kv_pad)                       # activations
            + (kt_pad + kv_pad + 1) * NUM_CLASSES_PADDED    # weights + bias
            + B_pad * NUM_CLASSES_PADDED                    # output tile
        ),
    )

    logits_padded = pl.pallas_call(
        classifier_kernel,
        out_shape=jax.ShapeDtypeStruct((B_pad, NUM_CLASSES_PADDED), jnp.float32),
        in_specs=[pl.BlockSpec(memory_space=pltpu.MemorySpace.VMEM)] * 5,
        out_specs=pl.BlockSpec(memory_space=pltpu.MemorySpace.VMEM),
        cost_estimate=cost,
    )(t, v, wt_pad, wv_pad, b_pad)

    return logits_padded[:B, :num_classes]


@functools.partial(jax.jit, static_argnums=(5,))
def _forward_xla(text_emb, image_emb, wt_pad, wv_pad, b_pad, num_classes):
    # Tiny-shape bypass: XLA fuses the two dots + bias + slice; no custom-call overhead.
    kt, kv = text_emb.shape[1], image_emb.shape[1]
    return (text_emb @ wt_pad[:kt, :num_classes]
            + image_emb @ wv_pad[:kv, :num_classes]
            + b_pad[0, :num_classes])


def my_model_forward(text_emb, image_emb, wt_pad, wv_pad, b_pad, num_classes,
                     force_pallas=False):
    total = text_emb.shape[0] * (text_emb.shape[1] + image_emb.shape[1])
    if force_pallas or total >= PALLAS_MIN_ELEMENTS:
        return _forward_pallas(text_emb, image_emb, wt_pad, wv_pad, b_pad, num_classes)
    return _forward_xla(text_emb, image_emb, wt_pad, wv_pad, b_pad, num_classes)


if __name__ == "__main__":
    # Small, deterministic synthetic shapes consistent with the module:
    #   hid_dim_t = 32, hid_dim_v = 32, num_classes = 4, batch = 8
    B, hid_dim_t, hid_dim_v, num_classes = 8, 32, 32, 4
    D = hid_dim_t + hid_dim_v

    key = jax.random.PRNGKey(0)
    k_t, k_v, k_w, k_b = jax.random.split(key, 4)

    # "Encoder outputs" (pooled embeddings) — stand-ins for encoder_t / encoder_v.
    text_emb = jax.random.normal(k_t, (B, hid_dim_t), dtype=jnp.float32)
    image_emb = jax.random.normal(k_v, (B, hid_dim_v), dtype=jnp.float32)

    # Deterministic classifier params (nn.Linear(D, 4) style uniform init),
    # stored transposed as [D, num_classes].
    bound = 1.0 / jnp.sqrt(D)
    w_classifier = jax.random.uniform(
        k_w, (D, num_classes), minval=-bound, maxval=bound, dtype=jnp.float32
    )
    b_classifier = jax.random.uniform(
        k_b, (num_classes,), minval=-bound, maxval=bound, dtype=jnp.float32
    )

    # One-time weight prep (split + bias + lane/sublane padding).
    wt_pad, wv_pad, b_pad = prepare_classifier_params(
        w_classifier, b_classifier, hid_dim_t, hid_dim_v
    )

    # Exercise the Pallas kernel (forced, since the demo size falls below the
    # tiny-shape bypass threshold) and the auto-dispatch path.
    logits_pallas = my_model_forward(
        text_emb, image_emb, wt_pad, wv_pad, b_pad, num_classes, force_pallas=True
    )
    logits_auto = my_model_forward(
        text_emb, image_emb, wt_pad, wv_pad, b_pad, num_classes
    )
    jax.block_until_ready(logits_pallas)
    jax.block_until_ready(logits_auto)

    # Reference check against plain JAX (concat + linear + bias).
    feats = jnp.concatenate([text_emb, image_emb], axis=1)
    ref = feats @ w_classifier + b_classifier
    assert logits_pallas.shape == (B, num_classes)
    assert jnp.allclose(logits_pallas, ref, atol=1e-5, rtol=1e-5)
    assert jnp.allclose(logits_auto, ref, atol=1e-5, rtol=1e-5)

    # TODO(synk): encoder_t (transformer) / encoder_v (CNN/ViT) backbones, the
    # tokenizer, dropout in training mode (p>0), and the unused head1-4 /
    # proj_t / proj_v layers are external or dead in forward() and are not
    # reimplemented here.
    print("KERNEL_OK")
</pallas_src>

<mosaic_0001>
module attributes {stable_mosaic.version = 11 : i64} {
  func.func @classifier_kernel(%arg0: memref<8x32xf32, #tpu.memory_space<vmem>>, %arg1: memref<8x32xf32, #tpu.memory_space<vmem>>, %arg2: memref<32x128xf32, #tpu.memory_space<vmem>>, %arg3: memref<32x128xf32, #tpu.memory_space<vmem>>, %arg4: memref<1x128xf32, #tpu.memory_space<vmem>>, %arg5: memref<8x128xf32, #tpu.memory_space<vmem>>) attributes {dimension_semantics = [], scalar_prefetch = 0 : i64, scratch_operands = 0 : i64, tpu.core_type = #tpu.core_type<tc>} {
    %c0 = arith.constant 0 : index
    %c0_0 = arith.constant 0 : index
    %0 = vector.load %arg0[%c0, %c0_0] : memref<8x32xf32, #tpu.memory_space<vmem>>, vector<8x32xf32>
    %c0_1 = arith.constant 0 : index
    %c0_2 = arith.constant 0 : index
    %1 = vector.load %arg2[%c0_1, %c0_2] : memref<32x128xf32, #tpu.memory_space<vmem>>, vector<32x128xf32>
    %cst = arith.constant dense<0.000000e+00> : vector<8x128xf32>
    %2 = tpu.matmul %0, %1, %cst {dimension_numbers = #tpu.dot_dimension_numbers<[1], [0], [0], [1], [0, 0, 1, 1], [], []>} : vector<8x32xf32>, vector<32x128xf32>, vector<8x128xf32> -> vector<8x128xf32>
    %c0_3 = arith.constant 0 : index
    %c0_4 = arith.constant 0 : index
    %3 = vector.load %arg1[%c0_3, %c0_4] : memref<8x32xf32, #tpu.memory_space<vmem>>, vector<8x32xf32>
    %c0_5 = arith.constant 0 : index
    %c0_6 = arith.constant 0 : index
    %4 = vector.load %arg3[%c0_5, %c0_6] : memref<32x128xf32, #tpu.memory_space<vmem>>, vector<32x128xf32>
    %cst_7 = arith.constant dense<0.000000e+00> : vector<8x128xf32>
    %5 = tpu.matmul %3, %4, %cst_7 {dimension_numbers = #tpu.dot_dimension_numbers<[1], [0], [0], [1], [0, 0, 1, 1], [], []>} : vector<8x32xf32>, vector<32x128xf32>, vector<8x128xf32> -> vector<8x128xf32>
    %6 = arith.addf %2, %5 : vector<8x128xf32>
    %c0_8 = arith.constant 0 : index
    %c0_9 = arith.constant 0 : index
    %7 = vector.load %arg4[%c0_8, %c0_9] : memref<1x128xf32, #tpu.memory_space<vmem>>, vector<1x128xf32>
    %8 = vector.broadcast %7 : vector<1x128xf32> to vector<8x128xf32>
    %9 = arith.addf %6, %8 : vector<8x128xf32>
    %c0_10 = arith.constant 0 : index
    %c0_11 = arith.constant 0 : index
    %10 = vector.load %arg5[%c0_10, %c0_11] : memref<8x128xf32, #tpu.memory_space<vmem>>, vector<8x128xf32>
    tpu.vector_store %arg5[%c0_10, %c0_11], %9 {strides = array<i32>} : memref<8x128xf32, #tpu.memory_space<vmem>>, vector<8x128xf32>,
    return
  }
}

</mosaic_0001>

<bundles_post_ra>
// kernel: _forward_pallas.1
= control target key start
LH: loop header
LB: loop body
LE: loop exit
PB: predicated region body
PF: predicated region fallthrough
CT: control target
= control target key end

     0   :  { %10 = vsyncpa [#allocation3], 0  ;;  %s487_s0 = inlined_call_operand.hbm [shape: f32[8,32], index: 0, kind: input, shape index: {}]   ;;  %s488_s1 = inlined_call_operand.hbm [shape: f32[8,32], index: 1, kind: input, shape index: {}]   ;;  %s489_s2 = inlined_call_operand.hbm [shape: f32[32,128], index: 2, kind: input, shape index: {}]   ;;  %s490_s3 = inlined_call_operand.hbm [shape: f32[32,128], index: 3, kind: input, shape index: {}]   ;;  %s491_s4 = inlined_call_operand.vmem [shape: f32[1,128], index: 4, kind: input, shape index: {}]   ;;  %s492_s5 = inlined_call_operand.vmem [shape: f32[8,128], index: 5, kind: output, shape index: {}]  }
   0x1   :  { %11 = vsyncpa [#allocation5], 0 }
   0x2   :  { %12 = vsyncpa [#allocation8], 0  ;;  %s394_s18 = smov [#allocation4]   ;;  %s395_s20 = smov [#allocation2]  }
   0x3   :  { %s29_s19 = sshll.u32 %s394_s18, 4  ;;  %s19_s21 = sshll.u32 %s395_s20, 4  ;;  %s30_s19 = int_to_ptr.vmem [resolvable:$true] %s29_s19  ;;  %s20_s21 = int_to_ptr.vmem [resolvable:$true] %s19_s21 }
   0x4   :  { %s300_s24 = scalar_lea.hbm %s488_s1, 128 }
   0x5   :  { %p301_p0 = scmp.ne.s32.totalorder %s488_s1, %s300_s24  ;;  %p304_p1 = scmp.lt.u32.totalorder %s300_s24, %s488_s1 }
   0x7   :  { %p306_p2 = pnand %p304_p1, %p301_p0 }
   0x9   :  { %309 = shalt.err (!%p306_p2)
}
   0xa   :  { %s310_s29 = scalar_lea.vmem %s30_s19, 128  ;;  %p315_p4 = scmp.lt.s32.totalorder %s30_s19, %s30_s19 }
   0xb   :  { %p311_p3 = scmp.ne.s32.totalorder %s30_s19, %s310_s29  ;;  %p316_p5 = scmp.lt.s32.totalorder %s310_s29, %s310_s29 }
   0xd   :  { %p317_p6 = por %p316_p5, %p315_p4 }
   0xf   :  { %p318_p7 = pnand %p317_p6, %p311_p3 }
  0x11   :  { %321 = shalt.err (!%p318_p7)
}
  0x12   :  { %32 = dma.hbm_to_vmem [thread:$0]  %s488_s1, 128, %s30_s19, [#allocation5]  }
  0x13   :  { %s322_s9 = scalar_lea.hbm %s487_s0, 128 }
  0x14   :  { %p323_p8 = scmp.ne.s32.totalorder %s487_s0, %s322_s9  ;;  %p326_p9 = scmp.lt.u32.totalorder %s322_s9, %s487_s0 }
  0x16   :  { %p328_p10 = pnand %p326_p9, %p323_p8 }
  0x18   :  { %331 = shalt.err (!%p328_p10)
}
  0x19   :  { %s332_s14 = scalar_lea.vmem %s20_s21, 128  ;;  %p337_p12 = scmp.lt.s32.totalorder %s20_s21, %s20_s21 }
  0x1a   :  { %p333_p11 = scmp.ne.s32.totalorder %s20_s21, %s332_s14  ;;  %p338_p13 = scmp.lt.s32.totalorder %s332_s14, %s332_s14 }
  0x1c   :  { %p339_p0 = por %p338_p13, %p337_p12 }
  0x1e   :  { %p340_p1 = pnand %p339_p0, %p333_p11 }
  0x20   :  { %343 = shalt.err (!%p340_p1)
}
  0x21   :  { %22 = dma.hbm_to_vmem [thread:$0]  %s487_s0, 128, %s20_s21, [#allocation3]  }
  0x22   :  { %s396_s16 = smov [#allocation6]   ;;  %s344_s20 = scalar_lea.hbm %s489_s2, 512 }
  0x23   :  { %s38_s17 = sshll.u32 %s396_s16, 4  ;;  %p345_p2 = scmp.ne.s32.totalorder %s489_s2, %s344_s20  ;;  %s39_s17 = int_to_ptr.vmem [resolvable:$true] %s38_s17 }
  0x24   :  { %p348_p3 = scmp.lt.u32.totalorder %s344_s20, %s489_s2 }
  0x26   :  { %p350_p4 = pnand %p348_p3, %p345_p2 }
  0x28   :  { %353 = shalt.err (!%p350_p4)
}
  0x29   :  { %s354_s26 = scalar_lea.vmem %s39_s17, 512  ;;  %p359_p6 = scmp.lt.s32.totalorder %s39_s17, %s39_s17 }
  0x2a   :  { %p355_p5 = scmp.ne.s32.totalorder %s39_s17, %s354_s26  ;;  %p360_p7 = scmp.lt.s32.totalorder %s354_s26, %s354_s26 }
  0x2c   :  { %p361_p8 = por %p360_p7, %p359_p6 }
  0x2e   :  { %p362_p9 = pnand %p361_p8, %p355_p5 }
  0x30   :  { %365 = shalt.err (!%p362_p9)
}
  0x31   :  { %s397_s0 = smov 128   ;;  %s398_s21 = smov 8  }
  0x32   :  { %44 = dma.hbm_to_vmem [thread:$0]  %s489_s2, 512, %s39_s17, [#allocation5], %s397_s0, %s397_s0, %s398_s21  }
  0x33   :  { %s399_s29 = smov [#allocation7]   ;;  %s366_s8 = scalar_lea.hbm %s490_s3, 512 }
  0x34   :  { %s50_s30 = sshll.u32 %s399_s29, 4  ;;  %p367_p10 = scmp.ne.s32.totalorder %s490_s3, %s366_s8  ;;  %s51_s30 = int_to_ptr.vmem [resolvable:$true] %s50_s30 }
  0x35   :  { %p370_p11 = scmp.lt.u32.totalorder %s366_s8, %s490_s3 }
  0x37   :  { %p372_p12 = pnand %p370_p11, %p367_p10 }
  0x39   :  { %375 = shalt.err (!%p372_p12)
}
  0x3a   :  { %s376_s13 = scalar_lea.vmem %s51_s30, 512  ;;  %p381_p0 = scmp.lt.s32.totalorder %s51_s30, %s51_s30 }
  0x3b   :  { %p377_p13 = scmp.ne.s32.totalorder %s51_s30, %s376_s13  ;;  %p382_p1 = scmp.lt.s32.totalorder %s376_s13, %s376_s13 }
  0x3d   :  { %p383_p2 = por %p382_p1, %p381_p0 }
  0x3f   :  { %p384_p3 = pnand %p383_p2, %p377_p13 }
  0x41   :  { %387 = shalt.err (!%p384_p3)
}
  0x42   :  { %56 = dma.hbm_to_vmem [thread:$0]  %s490_s3, 512, %s51_s30, [#allocation8], %s397_s0, %s397_s0, %s398_s21  }
  0x43   :  { %388 = dma.done.wait [#allocation3], 128  }
  0x44   :  { %389 = vsyncadd [#allocation3], 4294967168 }
  0x45   :  { %390 = dma.done.wait [#allocation5], 640  }
  0x46   :  { %391 = vsyncadd [#allocation5], 4294966656 }
  0x47   :  { %392 = dma.done.wait [#allocation8], 512  }
  0x48   :  { %393 = vsyncadd [#allocation8], 4294966784  ;;  %v400_v0 = vmov 0.0|0.0   ;;  %vm401_vm0 = vmmov 0   ;;  %v402_v1 = vmov 0.0   ;;  %v77_v2 = vld [vmem:[#allocation7] sm:$0xff] }
  0x49   :  { %279 = vmatprep.subr.bf16.mxu0 %v400_v0  ;;  %285 = vmatprep.subr.bf16.mxu1 %v400_v0  ;;  %v78_v3 = vld [vmem:[#allocation7 + $0x8] sm:$0xff]  ;;  %v72_v4 = vld [vmem:[#allocation6] sm:$0xff]  ;;  %v79_v7 = vld [vmem:[#allocation7 + $0x10] sm:$0xff]  ;;  %vm81_vm1 = vcmask 261120  }
  0x4a   :  { %265 = vmatprep.mubr.msk.f32.mxu0 %vm401_vm0, %v402_v1  ;;  %276 = vmatprep.mubr.msk.f32.mxu1 %vm401_vm0, %v402_v1  ;;  %v280_v5 = vpack.c.bf16 %v78_v3, %v77_v2  ;;  %v73_v6 = vld [vmem:[#allocation6 + $0x8] sm:$0xff]  ;;  %v80_v8 = vld [vmem:[#allocation7 + $0x18] sm:$0xff]  ;;  %v74_v10 = vld [vmem:[#allocation6 + $0x10] sm:$0xff] }
  0x4b   :  { %v286_v9 = vpack.c.bf16 %v73_v6, %v72_v4  ;;  %v75_v11 = vld [vmem:[#allocation6 + $0x18] sm:$0xff]  ;;  %v283_v12 = vpack.c.bf16 %v80_v8, %v79_v7  ;;  %v71_v15 = vld [vmem:[#allocation2] sm:$0xff] }
  0x4c   :  { %281 = vmatpush3.bf16.msra.mxu0 %v280_v5  ;;  %v289_v13 = vpack.c.bf16 %v75_v11, %v74_v10  ;;  %v76_v14 = vld [vmem:[#allocation4] sm:$0xff]  ;;  %v246_v18 = vld [vmem:[%s491_s4] ss:$0 sm:$0xff] }
  0x4d   :  { %287 = vmatpush3.bf16.msra.mxu1 %v286_v9  ;;  %282 = vmatprep.subr.bf16.mxu0 %v400_v0 }
  0x4e   :  { %288 = vmatprep.subr.bf16.mxu1 %v400_v0 }
  0x50   :  { %284 = vmatpush3.bf16.msra.mxu0 %v283_v12 }
  0x51   :  { %290 = vmatpush3.bf16.msra.mxu1 %v289_v13 }
  0x53   :  { %266 = vmatmul.mubr.msk.f32.vlgmr.msra.gmra.mrb[0].mxu0 %vm81_vm1, %v76_v14 }
  0x54   :  { %277 = vmatmul.mubr.msk.f32.vlgmr.msra.gmra.mrb[0].mxu1 %vm81_vm1, %v71_v15 }
 0x126   :  { %v151_v16 = vpop.f32.mrb[0].mxu0 }
 0x127   :  { %v224_v17 = vpop.f32.mrb[0].mxu1  ;;  %v267_v19 = vpop.f32.mrb[1].mxu0 }
 0x128   :  { %v225_v20 = vadd.f32 %v224_v17, %v151_v16  ;;  %v278_v21 = vpop.f32.mrb[1].mxu1 }
 0x12a   :  { %v235_v22 = vadd.f32 %v246_v18, %v225_v20 }
 0x12c   :  { %236 = vst [vmem:[%s492_s5] sm:$0xff] %v235_v22 }
 0x12d   :  { %241 = vsyncpa [#allocation3], 1 }
 0x12e   :  { %242 = vsyncpa [#allocation5], 1 }
 0x12f   :  { %243 = vsyncpa [#allocation8], 1 }

</bundles_post_ra>
